<compile_context>
chip_gen: v7x
topology: tpu7x:2x2x1
jax: 0.10.0
libtpu: 0.0.40
codegen_flags: <defaults>
</compile_context>

<pallas_src>
import jax
import jax.numpy as jnp
from jax.experimental import pallas as pl
from jax.experimental.pallas import tpu as pltpu


_VMEM_LIMIT_BYTES = 32 * 1024 * 1024   # explicit scoped-VMEM limit, safe on v5e/v6e/v7x
_VMEM_TILE_BUDGET = _VMEM_LIMIT_BYTES // 2  # per review: size tiles against <= half the limit


def _mlp_kernel(x_ref, w_ref, b_ref, o_ref):
    # x_ref: (C, TN)   w_ref: (E, C)   b_ref: (E, 1)   o_ref: (TN, E)
    acc = jnp.dot(w_ref[...], x_ref[...], preferred_element_type=jnp.float32)  # (E, TN)
    acc = acc + b_ref[...].astype(jnp.float32)
    # XLU transpose (idle slot here); writes (TN, E) blocks directly, so no
    # post-kernel transpose / extra HBM pass over the output is needed.
    o_ref[...] = jnp.transpose(acc).astype(o_ref.dtype)


def _pick_tile_n(N, C, E, itemsize, B):
    """Pick the N-tile: largest 128-multiple divisor of N fitting the VMEM
    budget, shrunk if needed so the grid has >= 2 parallel steps (v7x 2 TCs)."""
    if N < 256:
        return N  # single full-extent block (correct even if N % 128 != 0)

    # Double-buffered input (C, tile) + output (tile, E) blocks per grid step.
    per_lane_bytes = 2 * (C + E) * itemsize
    max_fit = max(128, (_VMEM_TILE_BUDGET // per_lane_bytes) // 128 * 128)

    def largest_divisor_tile(upper):
        t = min(N, upper) // 128 * 128
        while t >= 128:
            if N % t == 0:
                return t
            t -= 128
        return None

    tile = largest_divisor_tile(max_fit)
    if tile is None:
        return N  # no lane-aligned divisor; fall back to one full-extent block

    # Guarantee >= 2 total grid steps when possible so both v7x TCs get work.
    if B * (N // tile) < 2:
        smaller = largest_divisor_tile(tile // 2)
        if smaller is not None:
            tile = smaller
    return tile


def mlp_forward(x_nchw, weight, bias, *, tile_n=None):
    """MLP.forward: x.flatten(2).transpose(1, 2) -> Linear(C, E).

    x_nchw: (B, C, H, W); weight: (E, C) (PyTorch layout); bias: (E,).
    Returns (B, H*W, E), matching the PyTorch module.
    """
    B, C, H, W = x_nchw.shape
    E, C_w = weight.shape
    assert C_w == C, "weight shape must be (embed_dim, input_dim)"
    N = H * W
    itemsize = jnp.dtype(x_nchw.dtype).itemsize

    if tile_n is None:
        tile_n = _pick_tile_n(N, C, E, itemsize, B)
    assert N % tile_n == 0, "H*W must be divisible by tile_n"
    assert tile_n == N or tile_n % 128 == 0, "tile_n must be a multiple of 128"

    # flatten(2): NCHW -> (B, C, N). Pure reshape, no transpose / extra HBM pass.
    x_cn = x_nchw.reshape(B, C, N)
    b_col = bias.reshape(E, 1)  # broadcast over the lane (N) axis in-kernel

    n_tiles = N // tile_n
    if n_tiles == 1:
        # Never emit a degenerate extent-1 grid axis (per-step overhead bound).
        grid = (B,)
        in_specs = [
            pl.BlockSpec((pl.Squeezed(), C, tile_n), lambda b: (b, 0, 0)),
            pl.BlockSpec((E, C), lambda b: (0, 0)),
            pl.BlockSpec((E, 1), lambda b: (0, 0)),
        ]
        out_specs = pl.BlockSpec((pl.Squeezed(), tile_n, E), lambda b: (b, 0, 0))
        dim_sem = ("parallel",)
    else:
        grid = (B, n_tiles)
        in_specs = [
            pl.BlockSpec((pl.Squeezed(), C, tile_n), lambda b, n: (b, 0, n)),
            pl.BlockSpec((E, C), lambda b, n: (0, 0)),
            pl.BlockSpec((E, 1), lambda b, n: (0, 0)),
        ]
        out_specs = pl.BlockSpec((pl.Squeezed(), tile_n, E), lambda b, n: (b, n, 0))
        dim_sem = ("parallel", "parallel")

    flops = 2 * B * E * C * N
    bytes_accessed = itemsize * (B * C * N + E * C + E + B * N * E)

    return pl.pallas_call(
        _mlp_kernel,
        out_shape=jax.ShapeDtypeStruct((B, N, E), x_nchw.dtype),
        grid_spec=pltpu.PrefetchScalarGridSpec(
            num_scalar_prefetch=0,
            grid=grid,
            in_specs=in_specs,
            out_specs=out_specs,
        ),
        compiler_params=pltpu.CompilerParams(
            dimension_semantics=dim_sem,
            vmem_limit_bytes=_VMEM_LIMIT_BYTES),
        cost_estimate=pl.CostEstimate(
            flops=flops, transcendentals=0, bytes_accessed=bytes_accessed),
    )(x_cn, weight, b_col)


if __name__ == "__main__":
    # Small shapes consistent with the module: input_dim=C=4, embed_dim=32.
    B, C, H, W = 2, 4, 16, 16
    E = 32

    key = jax.random.PRNGKey(0)
    kx, kw, kb = jax.random.split(key, 3)

    x = jax.random.normal(kx, (B, C, H, W), dtype=jnp.float32)
    # Deterministic "Linear" params (PyTorch layout: weight (E, C), bias (E,))
    weight = jax.random.normal(kw, (E, C), dtype=jnp.float32) * 0.1
    bias = jax.random.normal(kb, (E,), dtype=jnp.float32) * 0.1

    out = mlp_forward(x, weight, bias)
    out = jax.block_until_ready(out)

    # Reference check against plain-JAX implementation of the PyTorch forward.
    x_tok = jnp.transpose(x.reshape(B, C, H * W), (0, 2, 1))
    ref = jnp.einsum("bnc,ec->bne", x_tok, weight) + bias
    assert out.shape == (B, H * W, E)
    assert jnp.allclose(out, ref, atol=1e-5, rtol=1e-5)

    print("KERNEL_OK")
</pallas_src>

<mosaic_0001>
module attributes {stable_mosaic.version = 11 : i64} {
  func.func @_mlp_kernel(%arg0: i32, %arg1: memref<1x4x256xf32, #tpu.memory_space<vmem>>, %arg2: memref<32x4xf32, #tpu.memory_space<vmem>>, %arg3: memref<32x1xf32, #tpu.memory_space<vmem>>, %arg4: memref<1x256x32xf32, #tpu.memory_space<vmem>>) attributes {dimension_semantics = [#tpu.dimension_semantics<parallel>], iteration_bounds = array<i64: 2>, scalar_prefetch = 0 : i64, scratch_operands = 0 : i64, tpu.core_type = #tpu.core_type<tc>, window_params = [{transform_indices = @transform_0, window_bounds = array<i64: 1, 4, 256>}, {pipeline_mode = #tpu.pipeline_mode<synchronous>, transform_indices = @transform_1, window_bounds = array<i64: 32, 4>}, {pipeline_mode = #tpu.pipeline_mode<synchronous>, transform_indices = @transform_2, window_bounds = array<i64: 32, 1>}, {transform_indices = @transform_3, window_bounds = array<i64: 1, 256, 32>}]} {
    %c0 = arith.constant 0 : index
    %c0_0 = arith.constant 0 : index
    %0 = vector.load %arg2[%c0, %c0_0] : memref<32x4xf32, #tpu.memory_space<vmem>>, vector<32x4xf32>
    %c0_1 = arith.constant 0 : index
    %c0_2 = arith.constant 0 : index
    %c0_3 = arith.constant 0 : index
    %1 = vector.load %arg1[%c0_1, %c0_2, %c0_3] : memref<1x4x256xf32, #tpu.memory_space<vmem>>, vector<1x4x256xf32>
    %2 = vector.shape_cast %1 : vector<1x4x256xf32> to vector<4x256xf32>
    %cst = arith.constant dense<0.000000e+00> : vector<32x256xf32>
    %3 = tpu.matmul %0, %2, %cst {dimension_numbers = #tpu.dot_dimension_numbers<[1], [0], [0], [1], [0, 0, 1, 1], [], []>} : vector<32x4xf32>, vector<4x256xf32>, vector<32x256xf32> -> vector<32x256xf32>
    %c0_4 = arith.constant 0 : index
    %c0_5 = arith.constant 0 : index
    %4 = vector.load %arg3[%c0_4, %c0_5] : memref<32x1xf32, #tpu.memory_space<vmem>>, vector<32x1xf32>
    %5 = vector.broadcast %4 : vector<32x1xf32> to vector<32x256xf32>
    %6 = arith.addf %3, %5 : vector<32x256xf32>
    %7 = tpu.transpose %6, [1, 0] : vector<32x256xf32> -> vector<256x32xf32>
    %c0_6 = arith.constant 0 : index
    %c0_7 = arith.constant 0 : index
    %c0_8 = arith.constant 0 : index
    %8 = vector.load %arg4[%c0_6, %c0_7, %c0_8] : memref<1x256x32xf32, #tpu.memory_space<vmem>>, vector<1x256x32xf32>
    %9 = vector.shape_cast %8 : vector<1x256x32xf32> to vector<256x32xf32>
    %10 = vector.shape_cast %7 : vector<256x32xf32> to vector<1x256x32xf32>
    tpu.vector_store %arg4[%c0_6, %c0_7, %c0_8], %10 {strides = array<i32>} : memref<1x256x32xf32, #tpu.memory_space<vmem>>, vector<1x256x32xf32>,
    return
  }
  func.func @transform_0(%arg0: i32) -> (i32, i32, i32) {
    %c0_i32 = arith.constant 0 : i32
    %c0_i32_0 = arith.constant 0 : i32
    %c0_i32_1 = arith.constant 0 : i32
    return %arg0, %c0_i32, %c0_i32_0 : i32, i32, i32
  }
  func.func @transform_1(%arg0: i32) -> (i32, i32) {
    %c0_i32 = arith.constant 0 : i32
    %c0_i32_0 = arith.constant 0 : i32
    %c0_i32_1 = arith.constant 0 : i32
    return %c0_i32, %c0_i32_0 : i32, i32
  }
  func.func @transform_2(%arg0: i32) -> (i32, i32) {
    %c0_i32 = arith.constant 0 : i32
    %c0_i32_0 = arith.constant 0 : i32
    %c0_i32_1 = arith.constant 0 : i32
    return %c0_i32, %c0_i32_0 : i32, i32
  }
  func.func @transform_3(%arg0: i32) -> (i32, i32, i32) {
    %c0_i32 = arith.constant 0 : i32
    %c0_i32_0 = arith.constant 0 : i32
    %c0_i32_1 = arith.constant 0 : i32
    return %arg0, %c0_i32, %c0_i32_0 : i32, i32, i32
  }
}

</mosaic_0001>

<bundles_post_ra>
// kernel: tpu_custom_call.1
= control target key start
LH: loop header
LB: loop body
LE: loop exit
PB: predicated region body
PF: predicated region fallthrough
CT: control target
= control target key end

     0   :  { %s525_s12 = smov 0   ;;  %s636_s0 = inlined_call_operand.vmem [shape: f32[2,4,256], index: 0, kind: input, shape index: {}]   ;;  %s637_s1 = inlined_call_operand.vmem [shape: f32[32,4], index: 1, kind: input, shape index: {}]   ;;  %s638_s2 = inlined_call_operand.vmem [shape: f32[32,1], index: 2, kind: input, shape index: {}]   ;;  %s639_s3 = inlined_call_operand.vmem [shape: f32[2,256,32], index: 3, kind: output, shape index: {}]  }
   0x1 LB: > { %s461_s13 = sadd.s32 4294967295, %s501_s12   ;;  %p465_p0 = scmp.ge.s32.totalorder %s501_s12, 1  ;;  %s501_s12 = sphi %s525_s12, %s13_s12  }
   0x2   : > { %p137_p1 = scmp.lt.s32.totalorder %s501_s12, 3 }
   0x4   : > { %p138_p2 = pnand %p465_p0, %p137_p1 }
   0x5   : > { %p161_p3 = scmp.lt.s32.totalorder (!%p138_p2), %s461_s13, 1  ;;  %v503_v0 = vmov (!%p138_p2), 0.0   ;;  %v176_v1 = vld [vmem:[%s638_s2] sm:$0xff] (!%p138_p2)  ;;  %v504_v2 = vmov (!%p138_p2), 0   ;;  %v178_v3 = vld [vmem:[%s638_s2 + $0x10] sm:$0xff] (!%p138_p2)  ;;  %v177_v4 = vld [vmem:[%s638_s2 + $0x8] sm:$0xff] (!%p138_p2) }
   0x6   : > { %141 = sbr.rel (%p138_p2) target bundleno = 426 (0x1aa), region = 32  ;;  %284 = vmatprep.mubr.f32.mxu0 (!%p138_p2), %v503_v0  ;;  %296 = vmatprep.mubr.f32.mxu1 (!%p138_p2), %v503_v0  ;;  %v179_v5 = vld [vmem:[%s638_s2 + $0x18] sm:$0xff] (!%p138_p2)  ;;  %vm215_vm0 = vcmask (!%p138_p2), 1043456   ;;  %v171_v8 = vld [vmem:[%s637_s1] sm:$0xff] (!%p138_p2)  ;;  %vm202_vm1 = vcmask (!%p138_p2), 31744   ;;  %v173_v9 = vld [vmem:[%s637_s1 + $0x10] sm:$0xff] (!%p138_p2) }
   0x7   : > { %492 = vset.pattern.permute.xlu0 (!%p138_p2), %v504_v2  ;;  %493 = vset.pattern.permute.xlu1 (!%p138_p2), %v504_v2  ;;  %v172_v10 = vld [vmem:[%s637_s1 + $0x8] sm:$0xff] (!%p138_p2)  ;;  %v174_v11 = vld [vmem:[%s637_s1 + $0x18] sm:$0xff] (!%p138_p2)  ;;  %vm373_vm2 = vcmask (!%p138_p2), 261120  }
   0x8   : > { %182 = vperm.xlu0 (!%p138_p2), %492, %v176_v1   ;;  %192 = vperm.xlu1 (!%p138_p2), %493, %v178_v3  }
   0xc   : > { %187 = vperm.xlu0 (!%p138_p2), %492, %v177_v4   ;;  %197 = vperm.xlu1 (!%p138_p2), %493, %v179_v5  }
   0xd   : > { %s641_s13 = smov (!%p161_p3, %s461_s13), 1 }
   0xe   : > { %s478_s18 = sshll.u32 %s641_s13, 3  ;;  %s479_s7 = sshll.u32 %s641_s13, 8 }
   0xf   : > { %s165_s25 = scalar_lea.vmem %s636_s0, %s478_s18  ;;  %s567_s10 = scalar_lea.vmem %s639_s3, %s479_s7 }
  0x10   : > { %v175_v6 = vld [vmem:[%s165_s25] sm:$0xff] }
  0x11   : > { %v201_v7 = vcombine.high %v175_v6, %v175_v6 }
  0x13   : > { %470 = vmatprep.subr.msk.mxu0 %vm215_vm0, %v201_v7  ;;  %480 = vmatprep.subr.msk.mxu1 %vm215_vm0, %v201_v7 }
  0x14   : > { %471 = vmatpush1.msk.msra.mxu0 %vm215_vm0, %v175_v6  ;;  %481 = vmatpush1.msk.msra.mxu1 %vm215_vm0, %v175_v6 }
  0x15   : > { %472 = vmatmul.mubr.msk.f32.vlgmr.msra.gmra.mrb[0].mxu0 %vm202_vm1, %v171_v8  ;;  %474 = vmatmul.mubr.msk.f32.vlgmr.msra.gmra.mrb[0].mxu1 %vm202_vm1, %v173_v9 }
  0x16   : > { %290 = vmatprep.mubr.f32.mxu0 %v503_v0  ;;  %302 = vmatprep.mubr.f32.mxu1 %v503_v0 }
  0x19   : > { %473 = vmatmul.mubr.msk.f32.gmra.mrb[2].mxu0 %vm202_vm1, %v172_v10  ;;  %475 = vmatmul.mubr.msk.f32.gmra.mrb[2].mxu1 %vm202_vm1, %v174_v11 }
  0x87   : > { %v183_v12 = vpop.permute.xlu0 %182  ;;  %v193_v20 = vpop.permute.xlu1 %192 }
  0x8b   : > { %v188_v19 = vpop.permute.xlu0 %187  ;;  %v198_v29 = vpop.permute.xlu1 %197 }
  0xe8   : > { %v286_v13 = vpop.f32.mrb[0].mxu0  ;;  %v298_v14 = vpop.f32.mrb[0].mxu1 }
  0xe9   : > { %v287_v15 = vadd.f32 %v286_v13, %v183_v12  ;;  %v288_v16 = vpop.f32.mrb[1].mxu0  ;;  %v300_v17 = vpop.f32.mrb[1].mxu1  ;;  %v299_v27 = vadd.f32 %v298_v14, %v193_v20 }
  0xea   : > { %v289_v18 = vadd.f32 %v288_v16, %v183_v12  ;;  %v301_v28 = vadd.f32 %v300_v17, %v193_v20 }
  0xeb   : > { %309 = vxpose.xlu0.b32.start [1/4] (short) %v287_v15, 128 }
  0xec   : > { %v292_v21 = vpop.f32.mrb[2].mxu0  ;;  %341 = vxpose.xlu1.b32.start [1/4] (short) %v289_v18, 128  ;;  %v304_v22 = vpop.f32.mrb[2].mxu1 }
  0xed   : > { %v293_v23 = vadd.f32 %v292_v21, %v188_v19  ;;  %v294_v24 = vpop.f32.mrb[3].mxu0  ;;  %v306_v25 = vpop.f32.mrb[3].mxu1  ;;  %v305_v30 = vadd.f32 %v304_v22, %v198_v29 }
  0xee   : > { %v295_v26 = vadd.f32 %v294_v24, %v188_v19  ;;  %v307_v31 = vadd.f32 %v306_v25, %v198_v29 }
  0xef   : > { %310 = vxpose.xlu0.b32.cont [2/4] (short) %v293_v23, 128 }
  0xf0   : > { %342 = vxpose.xlu1.b32.cont [2/4] (short) %v295_v26, 128 }
  0xf3   : > { %311 = vxpose.xlu0.b32.cont [3/4] (short) %v299_v27, 128 }
  0xf4   : > { %343 = vxpose.xlu1.b32.cont [3/4] (short) %v301_v28, 128 }
  0xf7   : > { %312 = vxpose.xlu0.b32.end [4/4] (short) %v305_v30, 128 }
  0xf8   : > { %344 = vxpose.xlu1.b32.end [4/4] (short) %v307_v31, 128 }
 0x16b   : > { %v325_v32 = vpop.trf.xlu0 }
 0x16c   : > { %v357_v33 = vpop.trf.xlu1  ;;  %374 = vst.msk [vmem:[%s567_s10] sm:$0xff] %vm373_vm2, %v325_v32 }
 0x16d   : > { %390 = vst.msk [vmem:[%s567_s10 + $0x80] sm:$0xff] %vm373_vm2, %v357_v33 }
 0x16f   : > { %v326_v34 = vpop.trf.xlu0 }
 0x170   : > { %v358_v35 = vpop.trf.xlu1  ;;  %375 = vst.msk [vmem:[%s567_s10 + $0x8] sm:$0xff] %vm373_vm2, %v326_v34 }
 0x171   : > { %391 = vst.msk [vmem:[%s567_s10 + $0x88] sm:$0xff] %vm373_vm2, %v358_v35 }
 0x173   : > { %v327_v36 = vpop.trf.xlu0 }
 0x174   : > { %v359_v37 = vpop.trf.xlu1  ;;  %376 = vst.msk [vmem:[%s567_s10 + $0x10] sm:$0xff] %vm373_vm2, %v327_v36 }
 0x175   : > { %392 = vst.msk [vmem:[%s567_s10 + $0x90] sm:$0xff] %vm373_vm2, %v359_v37 }
 0x177   : > { %v328_v38 = vpop.trf.xlu0 }
 0x178   : > { %v360_v39 = vpop.trf.xlu1  ;;  %377 = vst.msk [vmem:[%s567_s10 + $0x18] sm:$0xff] %vm373_vm2, %v328_v38 }
 0x179   : > { %393 = vst.msk [vmem:[%s567_s10 + $0x98] sm:$0xff] %vm373_vm2, %v360_v39 }
 0x17b   : > { %v329_v40 = vpop.trf.xlu0 }
 0x17c   : > { %v361_v41 = vpop.trf.xlu1  ;;  %378 = vst.msk [vmem:[%s567_s10 + $0x20] sm:$0xff] %vm373_vm2, %v329_v40 }
 0x17d   : > { %394 = vst.msk [vmem:[%s567_s10 + $0xa0] sm:$0xff] %vm373_vm2, %v361_v41 }
 0x17f   : > { %v330_v42 = vpop.trf.xlu0 }
 0x180   : > { %v362_v43 = vpop.trf.xlu1  ;;  %379 = vst.msk [vmem:[%s567_s10 + $0x28] sm:$0xff] %vm373_vm2, %v330_v42 }
 0x181   : > { %395 = vst.msk [vmem:[%s567_s10 + $0xa8] sm:$0xff] %vm373_vm2, %v362_v43 }
 0x183   : > { %v331_v44 = vpop.trf.xlu0 }
 0x184   : > { %v363_v45 = vpop.trf.xlu1  ;;  %380 = vst.msk [vmem:[%s567_s10 + $0x30] sm:$0xff] %vm373_vm2, %v331_v44 }
 0x185   : > { %396 = vst.msk [vmem:[%s567_s10 + $0xb0] sm:$0xff] %vm373_vm2, %v363_v45 }
 0x187   : > { %v332_v46 = vpop.trf.xlu0 }
 0x188   : > { %v364_v47 = vpop.trf.xlu1  ;;  %381 = vst.msk [vmem:[%s567_s10 + $0x38] sm:$0xff] %vm373_vm2, %v332_v46 }
 0x189   : > { %397 = vst.msk [vmem:[%s567_s10 + $0xb8] sm:$0xff] %vm373_vm2, %v364_v47 }
 0x18b   : > { %v333_v48 = vpop.trf.xlu0 }
 0x18c   : > { %v365_v49 = vpop.trf.xlu1  ;;  %382 = vst.msk [vmem:[%s567_s10 + $0x40] sm:$0xff] %vm373_vm2, %v333_v48 }
 0x18d   : > { %398 = vst.msk [vmem:[%s567_s10 + $0xc0] sm:$0xff] %vm373_vm2, %v365_v49 }
 0x18f   : > { %v334_v50 = vpop.trf.xlu0 }
 0x190   : > { %v366_v51 = vpop.trf.xlu1  ;;  %383 = vst.msk [vmem:[%s567_s10 + $0x48] sm:$0xff] %vm373_vm2, %v334_v50 }
 0x191   : > { %399 = vst.msk [vmem:[%s567_s10 + $0xc8] sm:$0xff] %vm373_vm2, %v366_v51 }
 0x193   : > { %v335_v52 = vpop.trf.xlu0 }
 0x194   : > { %v367_v53 = vpop.trf.xlu1  ;;  %384 = vst.msk [vmem:[%s567_s10 + $0x50] sm:$0xff] %vm373_vm2, %v335_v52 }
 0x195   : > { %400 = vst.msk [vmem:[%s567_s10 + $0xd0] sm:$0xff] %vm373_vm2, %v367_v53 }
 0x197   : > { %v336_v54 = vpop.trf.xlu0 }
 0x198   : > { %v368_v55 = vpop.trf.xlu1  ;;  %385 = vst.msk [vmem:[%s567_s10 + $0x58] sm:$0xff] %vm373_vm2, %v336_v54 }
 0x199   : > { %401 = vst.msk [vmem:[%s567_s10 + $0xd8] sm:$0xff] %vm373_vm2, %v368_v55 }
 0x19b   : > { %v337_v56 = vpop.trf.xlu0 }
 0x19c   : > { %v369_v57 = vpop.trf.xlu1  ;;  %386 = vst.msk [vmem:[%s567_s10 + $0x60] sm:$0xff] %vm373_vm2, %v337_v56 }
 0x19d   : > { %402 = vst.msk [vmem:[%s567_s10 + $0xe0] sm:$0xff] %vm373_vm2, %v369_v57 }
 0x19f   : > { %v338_v58 = vpop.trf.xlu0 }
 0x1a0   : > { %v370_v59 = vpop.trf.xlu1  ;;  %387 = vst.msk [vmem:[%s567_s10 + $0x68] sm:$0xff] %vm373_vm2, %v338_v58 }
 0x1a1   : > { %403 = vst.msk [vmem:[%s567_s10 + $0xe8] sm:$0xff] %vm373_vm2, %v370_v59 }
 0x1a3   : > { %v339_v60 = vpop.trf.xlu0 }
 0x1a4   : > { %v371_v61 = vpop.trf.xlu1  ;;  %388 = vst.msk [vmem:[%s567_s10 + $0x70] sm:$0xff] %vm373_vm2, %v339_v60 }
 0x1a5   : > { %404 = vst.msk [vmem:[%s567_s10 + $0xf0] sm:$0xff] %vm373_vm2, %v371_v61 }
 0x1a7   : > { %v340_v62 = vpop.trf.xlu0 }
 0x1a8   : > { %v372_v63 = vpop.trf.xlu1  ;;  %389 = vst.msk [vmem:[%s567_s10 + $0x78] sm:$0xff] %vm373_vm2, %v340_v62 }
 0x1a9   : > { %405 = vst.msk [vmem:[%s567_s10 + $0xf8] sm:$0xff] %vm373_vm2, %v372_v63 }
 0x1aa PF: > { %s13_s12 = sadd.s32 1, %s501_s12  }
 0x1ab   : > { %p10_p4 = scmp.ge.s32.totalorder %s13_s12, 4  }
 0x1ad   :  { %12 = sbr.rel (!%p10_p4) target bundleno = 1 (0x1), region = 62 }

</bundles_post_ra>
